<compile_context>
chip_gen: v5e
topology: v5e:2x2
jax: 0.10.0
libtpu: 0.0.40
codegen_flags: <defaults>
</compile_context>

<pallas_src>
import functools
import math

import jax
import jax.numpy as jnp
from jax.experimental import pallas as pl
from jax.experimental.pallas import tpu as pltpu


def _round_up(x: int, m: int) -> int:
    return ((x + m - 1) // m) * m


def _ipow(x, n: int):
    """x**n for positive integer n via exponentiation-by-squaring (VPU multiplies only)."""
    result = None
    base = x
    while n > 0:
        if n & 1:
            result = base if result is None else result * base
        n >>= 1
        if n:
            base = base * base
    return result


def _pow_const(x, p: float):
    """x**p with cheap special cases for integer / half-integer exponents."""
    n = int(round(p))
    if abs(p - n) < 1e-9 and 1 <= n <= 64:
        return _ipow(x, n)                       # pure VPU
    m = int(math.floor(p))
    if abs(p - (m + 0.5)) < 1e-9 and 0 <= m <= 64:
        r = jnp.sqrt(x)                          # single EUP op instead of log+exp
        return r if m == 0 else _ipow(x, m) * r
    return jnp.power(x, p)                       # general fallback (log+exp on EUP)


def _sharpen_kernel(x_ref, o_ref, *, inv_t: float):
    x = x_ref[...].astype(jnp.float32)
    tempered = _pow_const(x, inv_t)
    # Reduction over the class (lane) axis; keepdims for broadcasting.
    denom = jnp.sum(tempered, axis=-1, keepdims=True)
    # Exact reciprocal on the (tm, 1) denominator only, then broadcast multiply.
    out = tempered * (1.0 / denom)
    o_ref[...] = out.astype(o_ref.dtype)


def _vmem_capacity_bytes() -> int:
    try:
        return int(pltpu.get_tpu_info().vmem_capacity_bytes)
    except Exception:
        return 64 << 20  # conservative (v7x-like) if the query is unavailable


def sharpen(probabilities: jax.Array, temperature: float = 0.5) -> jax.Array:
    """probabilities: (B, C) float array; returns sharpened probs, same shape/dtype."""
    if not (math.isfinite(temperature) and temperature > 0.0):
        raise ValueError(f"temperature must be finite and > 0, got {temperature}")

    B, C = probabilities.shape
    inv_t = 1.0 / float(temperature)

    itemsize = jnp.dtype(probabilities.dtype).itemsize
    SUBLANE = 8 if itemsize >= 4 else 16  # (8,128) tiling for f32, (16,128) for bf16

    vmem_cap = _vmem_capacity_bytes()
    big_vmem = vmem_cap >= (96 << 20)        # v5e/v6e (128 MiB) vs v7x (64 MiB)
    target_block_bytes = (8 << 20) if big_vmem else (4 << 20)
    vmem_limit = (64 << 20) if big_vmem else (32 << 20)

    # Row tile sized so the f32 compute block is ~target_block_bytes.
    row_bytes_f32 = C * 4
    tm = max(SUBLANE, target_block_bytes // row_bytes_f32)
    tm = (tm // SUBLANE) * SUBLANE

    # v7x has 2 TensorCores sharing the "parallel" grid axis: for large-enough
    # batches keep >= ~4 grid steps so both cores stream (skip for tiny B).
    if not big_vmem and B >= 4 * SUBLANE:
        tm = min(tm, _round_up(pl.cdiv(B, 4), SUBLANE))

    if tm >= B:
        tm = B  # single block covering the full (possibly unaligned) batch

    # VMEM budget: 2x(in) + 2x(out) double-buffered blocks + ~2 block-sized f32
    # intermediates (x.astype(f32) and `tempered`) + slack. Grow the scoped limit
    # if a huge class count forces a big minimum block.
    # TODO(synk): for vocab-scale C (>~64K), tile the class axis with a two-pass
    # sum-then-normalize reduction instead of whole-row blocks.
    needed = 4 * tm * C * itemsize + 2 * tm * C * 4 + (2 << 20)
    vmem_limit = min(max(vmem_limit, needed), vmem_cap)

    grid = (pl.cdiv(B, tm),)
    kernel = functools.partial(_sharpen_kernel, inv_t=inv_t)

    return pl.pallas_call(
        kernel,
        out_shape=jax.ShapeDtypeStruct((B, C), probabilities.dtype),
        grid=grid,
        in_specs=[pl.BlockSpec((tm, C), lambda i: (i, 0))],
        out_specs=pl.BlockSpec((tm, C), lambda i: (i, 0)),
        compiler_params=pltpu.CompilerParams(
            dimension_semantics=("parallel",),
            vmem_limit_bytes=int(vmem_limit),
        ),
    )(probabilities)


if __name__ == "__main__":
    def _reference(p, t):
        tempered = jnp.power(p, 1.0 / t)
        return tempered / jnp.sum(tempered, axis=-1, keepdims=True)

    # Case 1: small, lane-unaligned class count, default T=0.5 (1/T = 2 -> x*x).
    key = jax.random.PRNGKey(0)
    B, C = 16, 32
    logits = jax.random.normal(key, (B, C), dtype=jnp.float32)
    probs = jax.nn.softmax(logits, axis=-1)  # valid probability distributions

    out = jax.block_until_ready(sharpen(probs, temperature=0.5))
    ref = _reference(probs, 0.5)
    assert out.shape == ref.shape and out.dtype == ref.dtype
    assert jnp.allclose(out, ref, atol=1e-5, rtol=1e-4), "mismatch vs reference (case 1)"
    assert jnp.allclose(jnp.sum(out, axis=-1), 1.0, atol=1e-4), "rows not normalized (case 1)"

    # Case 2: odd shapes + half-integer exponent (T=0.4 -> 1/T = 2.5 -> x*x*sqrt(x)).
    B2, C2 = 13, 10
    probs2 = jax.nn.softmax(
        jax.random.normal(jax.random.PRNGKey(0), (B2, C2), dtype=jnp.float32), axis=-1)
    out2 = jax.block_until_ready(sharpen(probs2, temperature=0.4))
    ref2 = _reference(probs2, 0.4)
    assert jnp.allclose(out2, ref2, atol=1e-5, rtol=1e-4), "mismatch vs reference (case 2)"
    assert jnp.allclose(jnp.sum(out2, axis=-1), 1.0, atol=1e-4), "rows not normalized (case 2)"

    print("KERNEL_OK")
</pallas_src>

<mosaic_0001>
module attributes {stable_mosaic.version = 11 : i64} {
  func.func @_sharpen_kernel(%arg0: i32, %arg1: memref<16x32xf32, #tpu.memory_space<vmem>>, %arg2: memref<16x32xf32, #tpu.memory_space<vmem>>) attributes {dimension_semantics = [#tpu.dimension_semantics<parallel>], iteration_bounds = array<i64: 1>, scalar_prefetch = 0 : i64, scratch_operands = 0 : i64, tpu.core_type = #tpu.core_type<tc>, window_params = [{transform_indices = @transform_0, window_bounds = array<i64: 16, 32>}, {transform_indices = @transform_1, window_bounds = array<i64: 16, 32>}]} {
    %c0 = arith.constant 0 : index
    %c0_0 = arith.constant 0 : index
    %0 = vector.load %arg1[%c0, %c0_0] : memref<16x32xf32, #tpu.memory_space<vmem>>, vector<16x32xf32>
    %1 = arith.mulf %0, %0 : vector<16x32xf32>
    %cst = arith.constant dense<0.000000e+00> : vector<16xf32>
    %2 = vector.multi_reduction <add>, %1, %cst [1] : vector<16x32xf32> to vector<16xf32>
    %3 = vector.shape_cast %2 : vector<16xf32> to vector<16x1xf32>
    %cst_1 = arith.constant 1.000000e+00 : f32
    %4 = vector.broadcast %cst_1 : f32 to vector<16x1xf32>
    %5 = arith.divf %4, %3 : vector<16x1xf32>
    %6 = vector.broadcast %5 : vector<16x1xf32> to vector<16x32xf32>
    %7 = arith.mulf %1, %6 : vector<16x32xf32>
    %c0_2 = arith.constant 0 : index
    %c0_3 = arith.constant 0 : index
    %8 = vector.load %arg2[%c0_2, %c0_3] : memref<16x32xf32, #tpu.memory_space<vmem>>, vector<16x32xf32>
    tpu.vector_store %arg2[%c0_2, %c0_3], %7 {strides = array<i32>} : memref<16x32xf32, #tpu.memory_space<vmem>>, vector<16x32xf32>,
    return
  }
  func.func @transform_0(%arg0: i32) -> (i32, i32) {
    %c0_i32 = arith.constant 0 : i32
    %c0_i32_0 = arith.constant 0 : i32
    return %arg0, %c0_i32 : i32, i32
  }
  func.func @transform_1(%arg0: i32) -> (i32, i32) {
    %c0_i32 = arith.constant 0 : i32
    %c0_i32_0 = arith.constant 0 : i32
    return %arg0, %c0_i32 : i32, i32
  }
}

</mosaic_0001>

<bundles_post_ra>
// kernel: tpu_custom_call.1
= control target key start
LH: loop header
LB: loop body
LE: loop exit
PB: predicated region body
PF: predicated region fallthrough
CT: control target
= control target key end

     0   :  { %6 = vsyncpa [#allocation3], 0  ;;  %s179_s0 = inlined_call_operand.hbm [shape: f32[16,32], index: 0, kind: input, shape index: {}]   ;;  %s180_s1 = inlined_call_operand.hbm [shape: f32[16,32], index: 1, kind: output, shape index: {}]  }
   0x1   :  { %7 = vsyncpa [#allocation4], 0  ;;  %s12_s8 = sshll.u32 %s179_s0, 4  ;;  %s149_s9 = smov [#allocation2]   ;;  %s13_s8 = int_to_ptr.hbm [resolvable:$true] %s12_s8 }
   0x2   :  { %s14_s10 = sshll.u32 %s149_s9, 4  ;;  %s150_s11 = smov 128   ;;  %s15_s10 = int_to_ptr.vmem [resolvable:$true] %s14_s10 }
   0x3   :  { %s151_s12 = smov 8  }
   0x4   :  { %20 = dma.hbm_to_vmem [thread:$0]  %s13_s8, 256, %s15_s10, [#allocation3], %s150_s11, %s150_s11, %s151_s12  }
   0x5   :  { %145 = dma.done.wait [#allocation3], 256  }
   0x6   :  { %146 = vsyncadd [#allocation3], 4294967040  ;;  %v25_v0 = vld [vmem:[#allocation2] sm:$0xff]  ;;  %vm29_vm0 = vcmask 261120   ;;  %v26_v2 = vld [vmem:[#allocation2 + $0x8] sm:$0xff]  ;;  %s152_s0 = smov [#allocation5]  }
   0x7   :  { %v27_v1 = vmul.f32 %v25_v0, %v25_v0  ;;  %v28_v4 = vmul.f32 %v26_v2, %v26_v2  ;;  %s74_s13 = sshll.u32 %s152_s0, 4  ;;  %s76_s16 = sshll.u32 %s180_s1, 4  ;;  %s75_s13 = int_to_ptr.vmem [resolvable:$true] %s74_s13  ;;  %s77_s16 = int_to_ptr.hbm [resolvable:$true] %s76_s16 }
   0x9   :  { %v30_v3 = vsel %vm29_vm0, %v27_v1, 0.0  ;;  %v33_v5 = vsel %vm29_vm0, %v28_v4, 0.0 }
   0xa   :  { %31 = vadd.xlane.f32.xlu0 %v30_v3 }
  0x12   :  { %34 = vadd.xlane.f32.xlu0 %v33_v5 }
  0x7d   :  { %v32_v6 = vpop.xlane.xlu0 %31 }
  0x7e   :  { %93 = vrcp.f32 %v32_v6  ;;  %v47_v11 = vand.u32 2147483648, %v32_v6  ;;  %v45_v13 = vand.u32 2147483647, %v32_v6  ;;  %vm41_vm2 = vweird.f32 %v32_v6 }
  0x80   :  { %v48_v16 = vor.u32 1.1754944e-38, %v47_v11  ;;  %vm46_vm4 = vcmp.eq.f32.partialorder %v45_v13, 8.507059e+37 }
  0x84   :  { %v94_v7 = vpop.eup %93 }
  0x85   :  { %v37_v8 = vmul.f32 %v94_v7, %v32_v6  ;;  %v35_v9 = vpop.xlane.xlu0 %34  ;;  %vm42_vm1 = vweird.f32 %v94_v7 }
  0x86   :  { %95 = vrcp.f32 %v35_v9  ;;  %vm43_vm3 = vmor %vm41_vm2, %vm42_vm1  ;;  %v62_v22 = vand.u32 2147483648, %v35_v9  ;;  %v60_v24 = vand.u32 2147483647, %v35_v9  ;;  %vm56_vm6 = vweird.f32 %v35_v9 }
  0x87   :  { %v38_v10 = vsub.f32 1.0, %v37_v8 }
  0x88   :  { %v63_v26 = vor.u32 1.1754944e-38, %v62_v22  ;;  %vm61_vm8 = vcmp.eq.f32.partialorder %v60_v24, 8.507059e+37 }
  0x89   :  { %v39_v12 = vmul.f32 %v94_v7, %v38_v10 }
  0x8b   :  { %v40_v14 = vadd.f32 %v94_v7, %v39_v12 }
  0x8c   :  { %v96_v15 = vpop.eup %95 }
  0x8d   :  { %v44_v17 = vsel %vm43_vm3, %v94_v7, %v40_v14  ;;  %v52_v18 = vmul.f32 %v96_v15, %v35_v9  ;;  %vm57_vm5 = vweird.f32 %v96_v15 }
  0x8e   :  { %v49_v19 = vsel %vm46_vm4, %v48_v16, %v44_v17  ;;  %vm58_vm7 = vmor %vm56_vm6, %vm57_vm5 }
  0x8f   :  { %v53_v20 = vsub.f32 1.0, %v52_v18  ;;  %v66_v21 = vmul.f32 %v49_v19, %v27_v1 }
  0x91   :  { %v54_v23 = vmul.f32 %v96_v15, %v53_v20  ;;  %68 = vst.msk [vmem:[#allocation5] sm:$0xff] %vm29_vm0, %v66_v21 }
  0x93   :  { %v55_v25 = vadd.f32 %v96_v15, %v54_v23 }
  0x95   :  { %v59_v27 = vsel %vm58_vm7, %v96_v15, %v55_v25 }
  0x96   :  { %v64_v28 = vsel %vm61_vm8, %v63_v26, %v59_v27 }
  0x97   :  { %v67_v29 = vmul.f32 %v64_v28, %v28_v4 }
  0x99   :  { %69 = vst.msk [vmem:[#allocation5 + $0x8] sm:$0xff] %vm29_vm0, %v67_v29 }
  0x9a   :  { %82 = dma.vmem_to_hbm [thread:$0]  %s75_s13, 256, %s77_s16, [#allocation4], %s150_s11, %s150_s11, %s151_s12  }
  0x9b   :  { %147 = dma.done.wait [#allocation4], 256  }
  0x9c   :  { %148 = vsyncadd [#allocation4], 4294967040 }
  0x9d   :  { %87 = vsyncpa [#allocation3], 1 }
  0x9e   :  { %88 = vsyncpa [#allocation4], 1 }

</bundles_post_ra>
